<compile_context>
chip_gen: v5e
topology: v5e:2x2
jax: 0.10.0
libtpu: 0.0.40
codegen_flags: <defaults>
</compile_context>

<pallas_src>
import functools

import jax
import jax.numpy as jnp
import numpy as np
from jax.experimental import pallas as pl
from jax.experimental.pallas import tpu as pltpu

LANE = 128
SUBLANE = 8
NEG_INF = -1e30      # pad-column bias; exp() underflows to exactly 0 in f32
TILE_B_CAP = 2048    # rows per grid step; a few MiB of VMEM at this size


def _cdiv(a, b):
    return -(-a // b)


def _round_up(x, m):
    return ((x + m - 1) // m) * m


def actor_kernel(x_ref, w1_ref, b1_ref, w2_ref, b2_ref, w3_ref, b3_ref, o_ref):
    # bf16 MXU operands, f32 accumulation + f32 elementwise (v5e-safe).
    x = x_ref[...].astype(jnp.bfloat16)

    # fc1 + ReLU
    h1 = jnp.dot(x, w1_ref[...], preferred_element_type=jnp.float32) + b1_ref[...]
    h1 = jnp.maximum(h1, 0.0)

    # fc2 + ReLU
    h2 = jnp.dot(h1.astype(jnp.bfloat16), w2_ref[...],
                 preferred_element_type=jnp.float32) + b2_ref[...]
    h2 = jnp.maximum(h2, 0.0)

    # fc3 (padded action columns carry a -1e30 bias -> contribute 0 to softmax)
    logits = jnp.dot(h2.astype(jnp.bfloat16), w3_ref[...],
                     preferred_element_type=jnp.float32) + b3_ref[...]

    # Numerically-stable log_softmax over the lane-dense (128-wide) action axis.
    m = jnp.max(logits, axis=-1, keepdims=True)
    shifted = logits - m
    lse = jnp.log(jnp.sum(jnp.exp(shifted), axis=-1, keepdims=True))
    o_ref[...] = (shifted - lse).astype(o_ref.dtype)


def _pad2(a, rows, cols, fill=0.0, dtype=None):
    dtype = a.dtype if dtype is None else dtype
    out = jnp.full((rows, cols), fill, dtype)
    return out.at[: a.shape[0], : a.shape[1]].set(a.astype(dtype))


def pad_params(params, input_size, hidden_size, action_size):
    """Pad weights/biases to lane-dense shapes; weights stored bf16 (MXU operands).

    w1 keeps its natural first dim (= input_size); only output dims are padded
    to multiples of 128 lanes.  The padded action-bias columns are set to -1e30
    so the in-kernel log_softmax over the full 128-wide block is numerically
    identical to a log_softmax over only the real action columns.
    """
    p_h = _round_up(hidden_size, LANE)
    p_a = _round_up(action_size, LANE)
    return {
        "w1": _pad2(params["w1"], input_size, p_h, dtype=jnp.bfloat16),
        "b1": _pad2(params["b1"], 1, p_h, dtype=jnp.float32),
        "w2": _pad2(params["w2"], p_h, p_h, dtype=jnp.bfloat16),
        "b2": _pad2(params["b2"], 1, p_h, dtype=jnp.float32),
        "w3": _pad2(params["w3"], p_h, p_a, dtype=jnp.bfloat16),
        "b3": _pad2(params["b3"], 1, p_a, fill=NEG_INF, dtype=jnp.float32),
    }


def _select_tile(batch):
    padded_batch = _round_up(batch, SUBLANE)
    if padded_batch <= TILE_B_CAP:
        tile_b = padded_batch
    else:
        # Even step count so v7x's two TensorCores both get batch tiles.
        n_steps = _round_up(_cdiv(padded_batch, TILE_B_CAP), 2)
        tile_b = _round_up(_cdiv(padded_batch, n_steps), SUBLANE)
    padded_batch = _round_up(padded_batch, tile_b)
    return tile_b, padded_batch


@functools.partial(jax.jit, static_argnames=("action_size",))
def actor_forward(x, padded_params, *, action_size):
    """x: (batch, input_size). Returns (batch, action_size) f32 log-probs."""
    p = padded_params
    batch, input_size = x.shape
    p_h = p["w1"].shape[1]
    p_a = p["w3"].shape[1]

    tile_b, padded_batch = _select_tile(batch)
    grid = (padded_batch // tile_b,)

    x = x.astype(jnp.float32)
    if padded_batch != batch:
        # Only the batch axis is padded (16 B/row); padded rows are garbage and
        # sliced off below.  No lane padding of x -> no 32x-inflated HBM copy.
        x = jnp.zeros((padded_batch, input_size), jnp.float32).at[:batch].set(x)

    batch_spec = lambda shape: pl.BlockSpec(shape, lambda i: (i, 0))
    resident = lambda shape: pl.BlockSpec(shape, lambda i: (0, 0))

    flops = 2 * padded_batch * (input_size * p_h + p_h * p_h + p_h * p_a)
    bytes_accessed = (
        x.size * x.dtype.itemsize
        + padded_batch * p_a * 4
        + sum(int(v.size) * v.dtype.itemsize for v in p.values())
    )
    cost = pl.CostEstimate(
        flops=flops,
        transcendentals=padded_batch * p_a,   # exp() in the softmax
        bytes_accessed=bytes_accessed,
    )

    out_padded = pl.pallas_call(
        actor_kernel,
        out_shape=jax.ShapeDtypeStruct((padded_batch, p_a), jnp.float32),
        grid=grid,
        in_specs=[
            batch_spec((tile_b, input_size)),   # x tile (natural last dim)
            resident(p["w1"].shape),            # weights/biases stay in VMEM
            resident(p["b1"].shape),
            resident(p["w2"].shape),
            resident(p["b2"].shape),
            resident(p["w3"].shape),
            resident(p["b3"].shape),
        ],
        out_specs=batch_spec((tile_b, p_a)),    # lane-dense (128-wide) stores
        compiler_params=pltpu.CompilerParams(
            dimension_semantics=("parallel",),  # v7x: split batch over 2 TCs
        ),
        cost_estimate=cost,
    )(x, p["w1"], p["b1"], p["w2"], p["b2"], p["w3"], p["b3"])

    return out_padded[:batch, :action_size]


def init_params(key, input_size, hidden_size, action_size):
    """Deterministic init mirroring nn.Linear's default U(-1/sqrt(fan_in), +)."""
    def linear(key, fan_in, fan_out):
        kw, kb = jax.random.split(key)
        bound = 1.0 / np.sqrt(fan_in)
        # stored transposed: (in, out)
        w = jax.random.uniform(kw, (fan_in, fan_out), jnp.float32, -bound, bound)
        b = jax.random.uniform(kb, (1, fan_out), jnp.float32, -bound, bound)
        return w, b

    k1, k2, k3 = jax.random.split(key, 3)
    w1, b1 = linear(k1, input_size, hidden_size)
    w2, b2 = linear(k2, hidden_size, hidden_size)
    w3, b3 = linear(k3, hidden_size, action_size)
    return {"w1": w1, "b1": b1, "w2": w2, "b2": b2, "w3": w3, "b3": b3}


def reference_f32(x, p):
    """Pure-f32 reference of the original PyTorch module."""
    h1 = jnp.maximum(x @ p["w1"] + p["b1"], 0.0)
    h2 = jnp.maximum(h1 @ p["w2"] + p["b2"], 0.0)
    return jax.nn.log_softmax(h2 @ p["w3"] + p["b3"], axis=-1)


def reference_bf16(x, pp, action_size):
    """Numerics-matched reference: bf16 MXU operands, f32 accumulate/elementwise."""
    def mm(a, w):
        return jnp.dot(a.astype(jnp.bfloat16), w, preferred_element_type=jnp.float32)
    h1 = jnp.maximum(mm(x, pp["w1"]) + pp["b1"], 0.0)
    h2 = jnp.maximum(mm(h1, pp["w2"]) + pp["b2"], 0.0)
    logits = mm(h2, pp["w3"]) + pp["b3"]
    return jax.nn.log_softmax(logits, axis=-1)[:, :action_size]


if __name__ == "__main__":
    # CartPole-like sizes: 4-dim observation, 32 hidden units, 2 actions.
    input_size, hidden_size, action_size = 4, 32, 2

    key = jax.random.PRNGKey(0)
    kp, kx1, kx2, kx3 = jax.random.split(key, 4)
    params = init_params(kp, input_size, hidden_size, action_size)
    padded = pad_params(params, input_size, hidden_size, action_size)

    # batch=2: single tiny tile.  batch=300: sublane-padded single tile.
    # batch=2500: exceeds the 2048-row cap -> 2-step grid (exercises the
    # batch-tiled pipeline / even split across v7x's TensorCores).
    for kx, batch in ((kx1, 2), (kx2, 300), (kx3, 2500)):
        x = jax.random.normal(kx, (batch, input_size), dtype=jnp.float32)
        out = jax.block_until_ready(
            actor_forward(x, padded, action_size=action_size))
        assert out.shape == (batch, action_size)

        # Tight check against a numerics-matched (bf16 MXU-operand) reference.
        ref_b = reference_bf16(x, padded, action_size)
        np.testing.assert_allclose(np.asarray(out), np.asarray(ref_b),
                                   atol=2e-3, rtol=2e-3)
        # Loose check against the true f32 module semantics (bf16 weight quant
        # introduces ~1e-2-scale deviations at most for these magnitudes).
        ref_f = reference_f32(x, params)
        np.testing.assert_allclose(np.asarray(out), np.asarray(ref_f),
                                   atol=5e-2, rtol=5e-2)

    print("KERNEL_OK")
</pallas_src>

<mosaic_0001>
module attributes {stable_mosaic.version = 11 : i64} {
  func.func @actor_kernel(%arg0: i32, %arg1: memref<8x4xf32, #tpu.memory_space<vmem>>, %arg2: memref<4x128xbf16, #tpu.memory_space<vmem>>, %arg3: memref<1x128xf32, #tpu.memory_space<vmem>>, %arg4: memref<128x128xbf16, #tpu.memory_space<vmem>>, %arg5: memref<1x128xf32, #tpu.memory_space<vmem>>, %arg6: memref<128x128xbf16, #tpu.memory_space<vmem>>, %arg7: memref<1x128xf32, #tpu.memory_space<vmem>>, %arg8: memref<8x128xf32, #tpu.memory_space<vmem>>) attributes {dimension_semantics = [#tpu.dimension_semantics<parallel>], iteration_bounds = array<i64: 1>, scalar_prefetch = 0 : i64, scratch_operands = 0 : i64, tpu.core_type = #tpu.core_type<tc>, window_params = [{transform_indices = @transform_0, window_bounds = array<i64: 8, 4>}, {pipeline_mode = #tpu.pipeline_mode<synchronous>, transform_indices = @transform_1, window_bounds = array<i64: 4, 128>}, {pipeline_mode = #tpu.pipeline_mode<synchronous>, transform_indices = @transform_2, window_bounds = array<i64: 1, 128>}, {pipeline_mode = #tpu.pipeline_mode<synchronous>, transform_indices = @transform_3, window_bounds = array<i64: 128, 128>}, {pipeline_mode = #tpu.pipeline_mode<synchronous>, transform_indices = @transform_4, window_bounds = array<i64: 1, 128>}, {pipeline_mode = #tpu.pipeline_mode<synchronous>, transform_indices = @transform_5, window_bounds = array<i64: 128, 128>}, {pipeline_mode = #tpu.pipeline_mode<synchronous>, transform_indices = @transform_6, window_bounds = array<i64: 1, 128>}, {transform_indices = @transform_7, window_bounds = array<i64: 8, 128>}]} {
    %c0 = arith.constant 0 : index
    %c0_0 = arith.constant 0 : index
    %0 = vector.load %arg1[%c0, %c0_0] : memref<8x4xf32, #tpu.memory_space<vmem>>, vector<8x4xf32>
    %1 = arith.truncf %0 : vector<8x4xf32> to vector<8x4xbf16>
    %c0_1 = arith.constant 0 : index
    %c0_2 = arith.constant 0 : index
    %2 = vector.load %arg2[%c0_1, %c0_2] : memref<4x128xbf16, #tpu.memory_space<vmem>>, vector<4x128xbf16>
    %cst = arith.constant dense<0.000000e+00> : vector<8x128xf32>
    %3 = tpu.matmul %1, %2, %cst {dimension_numbers = #tpu.dot_dimension_numbers<[1], [0], [0], [1], [0, 0, 1, 1], [], []>} : vector<8x4xbf16>, vector<4x128xbf16>, vector<8x128xf32> -> vector<8x128xf32>
    %c0_3 = arith.constant 0 : index
    %c0_4 = arith.constant 0 : index
    %4 = vector.load %arg3[%c0_3, %c0_4] : memref<1x128xf32, #tpu.memory_space<vmem>>, vector<1x128xf32>
    %5 = vector.broadcast %4 : vector<1x128xf32> to vector<8x128xf32>
    %6 = arith.addf %3, %5 : vector<8x128xf32>
    %cst_5 = arith.constant 0.000000e+00 : f32
    %7 = vector.broadcast %cst_5 : f32 to vector<8x128xf32>
    %8 = arith.maximumf %6, %7 : vector<8x128xf32>
    %9 = arith.truncf %8 : vector<8x128xf32> to vector<8x128xbf16>
    %c0_6 = arith.constant 0 : index
    %c0_7 = arith.constant 0 : index
    %10 = vector.load %arg4[%c0_6, %c0_7] : memref<128x128xbf16, #tpu.memory_space<vmem>>, vector<128x128xbf16>
    %cst_8 = arith.constant dense<0.000000e+00> : vector<8x128xf32>
    %11 = tpu.matmul %9, %10, %cst_8 {dimension_numbers = #tpu.dot_dimension_numbers<[1], [0], [0], [1], [0, 0, 1, 1], [], []>} : vector<8x128xbf16>, vector<128x128xbf16>, vector<8x128xf32> -> vector<8x128xf32>
    %c0_9 = arith.constant 0 : index
    %c0_10 = arith.constant 0 : index
    %12 = vector.load %arg5[%c0_9, %c0_10] : memref<1x128xf32, #tpu.memory_space<vmem>>, vector<1x128xf32>
    %13 = vector.broadcast %12 : vector<1x128xf32> to vector<8x128xf32>
    %14 = arith.addf %11, %13 : vector<8x128xf32>
    %cst_11 = arith.constant 0.000000e+00 : f32
    %15 = vector.broadcast %cst_11 : f32 to vector<8x128xf32>
    %16 = arith.maximumf %14, %15 : vector<8x128xf32>
    %17 = arith.truncf %16 : vector<8x128xf32> to vector<8x128xbf16>
    %c0_12 = arith.constant 0 : index
    %c0_13 = arith.constant 0 : index
    %18 = vector.load %arg6[%c0_12, %c0_13] : memref<128x128xbf16, #tpu.memory_space<vmem>>, vector<128x128xbf16>
    %cst_14 = arith.constant dense<0.000000e+00> : vector<8x128xf32>
    %19 = tpu.matmul %17, %18, %cst_14 {dimension_numbers = #tpu.dot_dimension_numbers<[1], [0], [0], [1], [0, 0, 1, 1], [], []>} : vector<8x128xbf16>, vector<128x128xbf16>, vector<8x128xf32> -> vector<8x128xf32>
    %c0_15 = arith.constant 0 : index
    %c0_16 = arith.constant 0 : index
    %20 = vector.load %arg7[%c0_15, %c0_16] : memref<1x128xf32, #tpu.memory_space<vmem>>, vector<1x128xf32>
    %21 = vector.broadcast %20 : vector<1x128xf32> to vector<8x128xf32>
    %22 = arith.addf %19, %21 : vector<8x128xf32>
    %cst_17 = arith.constant dense<0xFF800000> : vector<8xf32>
    %23 = vector.multi_reduction <maximumf>, %22, %cst_17 [1] : vector<8x128xf32> to vector<8xf32>
    %24 = vector.shape_cast %23 : vector<8xf32> to vector<8x1xf32>
    %25 = vector.broadcast %24 : vector<8x1xf32> to vector<8x128xf32>
    %26 = arith.subf %22, %25 : vector<8x128xf32>
    %27 = math.exp %26 : vector<8x128xf32>
    %cst_18 = arith.constant dense<0.000000e+00> : vector<8xf32>
    %28 = vector.multi_reduction <add>, %27, %cst_18 [1] : vector<8x128xf32> to vector<8xf32>
    %29 = vector.shape_cast %28 : vector<8xf32> to vector<8x1xf32>
    %30 = math.log %29 : vector<8x1xf32>
    %31 = vector.broadcast %30 : vector<8x1xf32> to vector<8x128xf32>
    %32 = arith.subf %26, %31 : vector<8x128xf32>
    %c0_19 = arith.constant 0 : index
    %c0_20 = arith.constant 0 : index
    %33 = vector.load %arg8[%c0_19, %c0_20] : memref<8x128xf32, #tpu.memory_space<vmem>>, vector<8x128xf32>
    tpu.vector_store %arg8[%c0_19, %c0_20], %32 {strides = array<i32>} : memref<8x128xf32, #tpu.memory_space<vmem>>, vector<8x128xf32>,
    return
  }
  func.func @transform_0(%arg0: i32) -> (i32, i32) {
    %c0_i32 = arith.constant 0 : i32
    %c0_i32_0 = arith.constant 0 : i32
    return %arg0, %c0_i32 : i32, i32
  }
  func.func @transform_1(%arg0: i32) -> (i32, i32) {
    %c0_i32 = arith.constant 0 : i32
    %c0_i32_0 = arith.constant 0 : i32
    %c0_i32_1 = arith.constant 0 : i32
    return %c0_i32, %c0_i32_0 : i32, i32
  }
  func.func @transform_2(%arg0: i32) -> (i32, i32) {
    %c0_i32 = arith.constant 0 : i32
    %c0_i32_0 = arith.constant 0 : i32
    %c0_i32_1 = arith.constant 0 : i32
    return %c0_i32, %c0_i32_0 : i32, i32
  }
  func.func @transform_3(%arg0: i32) -> (i32, i32) {
    %c0_i32 = arith.constant 0 : i32
    %c0_i32_0 = arith.constant 0 : i32
    %c0_i32_1 = arith.constant 0 : i32
    return %c0_i32, %c0_i32_0 : i32, i32
  }
  func.func @transform_4(%arg0: i32) -> (i32, i32) {
    %c0_i32 = arith.constant 0 : i32
    %c0_i32_0 = arith.constant 0 : i32
    %c0_i32_1 = arith.constant 0 : i32
    return %c0_i32, %c0_i32_0 : i32, i32
  }
  func.func @transform_5(%arg0: i32) -> (i32, i32) {
    %c0_i32 = arith.constant 0 : i32
    %c0_i32_0 = arith.constant 0 : i32
    %c0_i32_1 = arith.constant 0 : i32
    return %c0_i32, %c0_i32_0 : i32, i32
  }
  func.func @transform_6(%arg0: i32) -> (i32, i32) {
    %c0_i32 = arith.constant 0 : i32
    %c0_i32_0 = arith.constant 0 : i32
    %c0_i32_1 = arith.constant 0 : i32
    return %c0_i32, %c0_i32_0 : i32, i32
  }
  func.func @transform_7(%arg0: i32) -> (i32, i32) {
    %c0_i32 = arith.constant 0 : i32
    %c0_i32_0 = arith.constant 0 : i32
    return %arg0, %c0_i32 : i32, i32
  }
}

</mosaic_0001>

<bundles_post_ra>
// kernel: actor_forward.1
= control target key start
LH: loop header
LB: loop body
LE: loop exit
PB: predicated region body
PF: predicated region fallthrough
CT: control target
= control target key end

     0   :  { %12 = vsyncpa [#allocation3], 0  ;;  %s482_s0 = inlined_call_operand.vmem [shape: f32[8,4], index: 0, kind: input, shape index: {}]   ;;  %s483_s1 = inlined_call_operand.vmem [shape: bf16[4,128], index: 1, kind: input, shape index: {}]   ;;  %s484_s2 = inlined_call_operand.vmem [shape: f32[1,128], index: 2, kind: input, shape index: {}]   ;;  %s485_s3 = inlined_call_operand.hbm [shape: bf16[128,128], index: 3, kind: input, shape index: {}]   ;;  %s486_s4 = inlined_call_operand.vmem [shape: f32[1,128], index: 4, kind: input, shape index: {}]   ;;  %s487_s5 = inlined_call_operand.hbm [shape: bf16[128,128], index: 5, kind: input, shape index: {}]   ;;  %s488_s6 = inlined_call_operand.vmem [shape: f32[1,128], index: 6, kind: input, shape index: {}]   ;;  %s489_s7 = inlined_call_operand.vmem [shape: f32[8,128], index: 7, kind: output, shape index: {}]  }
   0x1   :  { %s24_s26 = sshll.u32 %s485_s3, 4  ;;  %s25_s26 = int_to_ptr.hbm [resolvable:$true] %s24_s26 }
   0x2   :  { %13 = vsyncpa [#allocation5], 0  ;;  %s414_s27 = smov [#allocation2]   ;;  %s39_s8 = sshll.u32 %s487_s5, 4  ;;  %s40_s8 = int_to_ptr.hbm [resolvable:$true] %s39_s8 }
   0x3   :  { %s26_s28 = sshll.u32 %s414_s27, 4  ;;  %s415_s9 = smov 64   ;;  %s27_s28 = int_to_ptr.vmem [resolvable:$true] %s26_s28 }
   0x4   :  { %s416_s10 = smov 4   ;;  %s417_s11 = smov [#allocation4]  }
   0x5   :  { %32 = dma.hbm_to_vmem [thread:$0]  %s25_s26, 1024, %s27_s28, [#allocation3], %s415_s9, %s415_s9, %s416_s10  }
   0x6   :  { %s41_s12 = sshll.u32 %s417_s11, 4  ;;  %s42_s12 = int_to_ptr.vmem [resolvable:$true] %s41_s12 }
   0x7   :  { %47 = dma.hbm_to_vmem [thread:$0]  %s40_s8, 1024, %s42_s12, [#allocation5], %s415_s9, %s415_s9, %s416_s10  }
   0x8   :  { %410 = dma.done.wait [#allocation3], 1024  }
   0x9   :  { %411 = vsyncadd [#allocation3], 4294966272 }
   0xa   :  { %412 = dma.done.wait [#allocation5], 1024  }
   0xb   :  { %413 = vsyncadd [#allocation5], 4294966272  ;;  %vm70_vm0 = vcmask 1041408   ;;  %v61_v0 = vld [vmem:[%s483_s1] sm:$0x3]  ;;  %v342_v2 = vld [vmem:[#allocation2 + $0x38] sm:$0xff] }
   0xc   :  { %v59_v1 = vld [vmem:[%s482_s0] sm:$0xff]  ;;  %v72_v3 = vsel %vm70_vm0, %v61_v0, 0  ;;  %vm66_vm1 = vcmask 31744   ;;  %157 = vmatpush.bf16.msra.mxu1 %v342_v2  ;;  %v341_v5 = vld [vmem:[#allocation2 + $0x30] sm:$0xff]  ;;  %v340_v6 = vld [vmem:[#allocation2 + $0x28] sm:$0xff] }
   0xd   :  { %v60_v4 = vpack.c.bf16 %v59_v1, %v59_v1  ;;  %81 = vmatpush.bf16.msra.mxu0 %v72_v3  ;;  %v339_v7 = vld [vmem:[#allocation2 + $0x20] sm:$0xff]  ;;  %v338_v8 = vld [vmem:[#allocation2 + $0x18] sm:$0xff]  ;;  %v337_v9 = vld [vmem:[#allocation2 + $0x10] sm:$0xff] }
   0xe   :  { %v336_v10 = vld [vmem:[#allocation2 + $0x8] sm:$0xff]  ;;  %v335_v11 = vld [vmem:[#allocation2] sm:$0xff]  ;;  %v350_v12 = vld [vmem:[#allocation4 + $0x38] sm:$0xff] }
   0xf   :  { %240 = vmatpush.bf16.msra.mxu2 %v350_v12  ;;  %v349_v13 = vld [vmem:[#allocation4 + $0x30] sm:$0xff]  ;;  %v348_v14 = vld [vmem:[#allocation4 + $0x28] sm:$0xff]  ;;  %v347_v15 = vld [vmem:[#allocation4 + $0x20] sm:$0xff] }
  0x10   :  { %270 = vmatmul.msk.bf16.vlgmr.msra.gmra.mxu0 %vm66_vm1, %v60_v4  ;;  %158 = vmatpush.bf16.msra.mxu1 %v341_v5  ;;  %v346_v16 = vld [vmem:[#allocation4 + $0x18] sm:$0xff]  ;;  %v345_v17 = vld [vmem:[#allocation4 + $0x10] sm:$0xff]  ;;  %v355_v18 = vld [vmem:[%s484_s2] ss:$0 sm:$0xff] }
  0x11   :  { %v344_v24 = vld [vmem:[#allocation4 + $0x8] sm:$0xff]  ;;  %v343_v25 = vld [vmem:[#allocation4] sm:$0xff] }
  0x12   :  { %v356_v26 = vld [vmem:[%s486_s4] ss:$0 sm:$0xff] }
  0x13   :  { %241 = vmatpush.bf16.msra.mxu2 %v349_v13  ;;  %v357_v32 = vld [vmem:[%s488_s6] ss:$0 sm:$0xff] }
  0x14   :  { %159 = vmatpush.bf16.msra.mxu1 %v340_v6 }
  0x17   :  { %242 = vmatpush.bf16.msra.mxu2 %v348_v14 }
  0x18   :  { %160 = vmatpush.bf16.msra.mxu1 %v339_v7 }
  0x1b   :  { %243 = vmatpush.bf16.msra.mxu2 %v347_v15 }
  0x1c   :  { %161 = vmatpush.bf16.msra.mxu1 %v338_v8 }
  0x1f   :  { %244 = vmatpush.bf16.msra.mxu2 %v346_v16 }
  0x20   :  { %162 = vmatpush.bf16.msra.mxu1 %v337_v9 }
  0x23   :  { %245 = vmatpush.bf16.msra.mxu2 %v345_v17 }
  0x24   :  { %163 = vmatpush.bf16.msra.mxu1 %v336_v10 }
  0x27   :  { %246 = vmatpush.bf16.msra.mxu2 %v344_v24 }
  0x28   :  { %164 = vmatpush.bf16.msra.mxu1 %v335_v11 }
  0x2b   :  { %247 = vmatpush.bf16.msra.mxu2 %v343_v25 }
  0x8d   :  { %v83_v19 = vpop.f32.mrf.mxu0 }
  0x8e   :  { %v84_v20 = vadd.f32 %v355_v18, %v83_v19 }
  0x90   :  { %v87_v21 = vmax.f32 %v84_v20, 0.0 }
  0x92   :  { %v88_v22 = vpack.c.bf16 %v87_v21, %v87_v21 }
  0x94   :  { %165 = vmatmul.bf16.vlgmr.msra.gmra.mxu1 %v88_v22 }
  0x95   :  { %v85_v23 = vpop.f32.mrf.mxu0 }
 0x111   :  { %v166_v27 = vpop.f32.mrf.mxu1 }
 0x112   :  { %v167_v28 = vadd.f32 %v356_v26, %v166_v27 }
 0x114   :  { %v170_v29 = vmax.f32 %v167_v28, 0.0 }
 0x116   :  { %v171_v30 = vpack.c.bf16 %v170_v29, %v170_v29 }
 0x118   :  { %248 = vmatmul.bf16.vlgmr.msra.gmra.mxu2 %v171_v30 }
 0x119   :  { %v168_v31 = vpop.f32.mrf.mxu1 }
 0x19b   :  { %v249_v33 = vpop.f32.mrf.mxu2 }
 0x19c   :  { %v250_v34 = vadd.f32 %v357_v32, %v249_v33 }
 0x19e   :  { %253 = vmax.xlane.f32.xlu0 %v250_v34 }
 0x1a3   :  { %v251_v35 = vpop.f32.mrf.mxu2 }
 0x211   :  { %v254_v36 = vpop.xlane.xlu0 %253 }
 0x212   :  { %v255_v37 = vsub.f32 %v250_v34, %v254_v36 }
 0x214   :  { %v256_v38 = vmul.f32 1.442695, %v255_v37 }
 0x216   :  { %358 = vpow2.f32 %v256_v38 }
 0x21c   :  { %v359_v39 = vpop.eup %358 }
 0x21d   :  { %258 = vadd.xlane.f32.xlu0 %v359_v39 }
 0x290   :  { %v259_v40 = vpop.xlane.xlu0 %258 }
 0x291   :  { %360 = vlog2.f32 %v259_v40 }
 0x297   :  { %v361_v41 = vpop.eup %360 }
 0x298   :  { %v261_v42 = vmul.f32 0.6931472, %v361_v41 }
 0x29a   :  { %v262_v43 = vsub.f32 %v255_v37, %v261_v42 }
 0x29c   :  { %263 = vst [vmem:[%s489_s7] sm:$0xff] %v262_v43 }
 0x29d   :  { %268 = vsyncpa [#allocation3], 1 }
 0x29e   :  { %269 = vsyncpa [#allocation5], 1 }

</bundles_post_ra>
